<compile_context>
chip_gen: v7x
topology: tpu7x:2x2x1
jax: 0.10.0
libtpu: 0.0.40
codegen_flags: <defaults>
</compile_context>

<pallas_src>
import jax
import jax.numpy as jnp
import numpy as np
from jax.experimental import pallas as pl
from jax.experimental.pallas import tpu as pltpu


# ----------------------------------------------------------------------------
# Parameter packing: one [R, C] f32 buffer, 8-row-aligned segments
# ----------------------------------------------------------------------------
def _pack_params(entries):
    """entries: list of (W [in,out], b [1,out] or None).

    Returns (packed [R, C] f32, layout) where layout[i] = (w_off, in_k, out_k,
    b_off) with static Python ints, usable for static slicing inside the kernel.
    """
    C = max(int(W.shape[1]) for W, _ in entries)
    blocks, layout, off = [], [], 0
    for W, b in entries:
        in_k, out_k = int(W.shape[0]), int(W.shape[1])
        rows_w = -(-in_k // 8) * 8                      # sublane-aligned segment
        Wp = jnp.zeros((rows_w, C), jnp.float32).at[:in_k, :out_k].set(W)
        blocks.append(Wp)
        w_off = off
        off += rows_w
        b_off = None
        if b is not None:
            bp = jnp.zeros((8, C), jnp.float32).at[0:1, :out_k].set(b)
            blocks.append(bp)
            b_off = off
            off += 8
        layout.append((w_off, in_k, out_k, b_off))
    packed = jnp.concatenate(blocks, axis=0)
    return packed, tuple(layout)


# ----------------------------------------------------------------------------
# Pallas kernel (fixed layer counts / shapes baked in via closure)
# ----------------------------------------------------------------------------
def _make_koopman_kernel(layout, n_enc, n_dec, steps, latent):
    enc_ids = tuple(range(n_enc))
    wpow_id = n_enc
    dec_ids = tuple(range(n_enc + 1, n_enc + 1 + n_dec))

    def kernel(x_ref, pack_ref, out_ref):
        def weight(i):
            w_off, in_k, out_k, b_off = layout[i]
            W = pack_ref[w_off:w_off + in_k, :out_k]
            b = None if b_off is None else pack_ref[b_off:b_off + 1, :out_k]
            return W, b

        def mlp(h, ids):
            # Linear layers with tanh between them (not after the last):
            # exactly DecoderNet / EncoderNet semantics.
            for j, i in enumerate(ids):
                W, b = weight(i)
                h = jnp.dot(h, W, preferred_element_type=jnp.float32) + b
                if j < len(ids) - 1:
                    h = jnp.tanh(h)
            return h

        x = x_ref[...]
        z = mlp(x, enc_ids)                                   # [B, latent]

        # All rollout latents in one matmul: z @ [D, D^2, ..., D^steps]
        Wpow, _ = weight(wpow_id)                              # [latent, steps*latent]
        zW = jnp.dot(z, Wpow, preferred_element_type=jnp.float32)

        # Batched decode of [q_1; q_2; ...; q_steps; z] in a single MLP pass.
        lat = [zW[:, s * latent:(s + 1) * latent] for s in range(steps)] + [z]
        h_all = jnp.concatenate(lat, axis=0)                   # [(steps+1)*B, latent]
        out_ref[...] = mlp(h_all, dec_ids).astype(out_ref.dtype)

    return kernel


# ----------------------------------------------------------------------------
# Wrapper (precompute + pallas_call + unpack)
# ----------------------------------------------------------------------------
def koopman_forward(x, params, mode="forward"):
    enc_w, enc_b = params["enc_w"], params["enc_b"]
    dec_w, dec_b = params["dec_w"], params["dec_b"]
    if mode == "forward":
        dyn, steps = params["dyn_fwd"], params["steps"]
    elif mode == "backward":
        dyn, steps = params["dyn_back"], params["steps_back"]
    else:
        raise ValueError(mode)

    B = x.shape[0]
    latent = dyn.shape[0]
    d_out = dec_w[-1].shape[1]
    n_enc, n_dec = len(enc_w), len(dec_w)

    # One-time tiny precompute outside the kernel (not on the hot path):
    # powers of the (kernel-form, already transposed) dynamics matrix.
    powers, P = [], dyn
    for _ in range(steps):
        powers.append(P)
        P = jnp.dot(P, dyn, precision=jax.lax.Precision.HIGHEST)
    Wpow = jnp.concatenate(powers, axis=1)                     # [latent, steps*latent]

    entries = ([(enc_w[k], enc_b[k]) for k in range(n_enc)]
               + [(Wpow, None)]
               + [(dec_w[k], dec_b[k]) for k in range(n_dec)])
    packed, layout = _pack_params(entries)

    kernel = _make_koopman_kernel(layout, n_enc, n_dec, steps, latent)
    vmem = pl.BlockSpec(memory_space=pltpu.MemorySpace.VMEM)

    out_all = pl.pallas_call(
        kernel,
        out_shape=jax.ShapeDtypeStruct(((steps + 1) * B, d_out), jnp.float32),
        in_specs=[vmem, vmem],
        out_specs=vmem,
    )(x, packed)

    # Mirror the PyTorch (list-of-tensors, list-of-tensors) return structure.
    outs = [out_all[s * B:(s + 1) * B] for s in range(steps)]
    out_id = [out_all[steps * B:]]
    return outs, out_id


# ----------------------------------------------------------------------------
# Deterministic parameter init (mirrors module __init__ shapes)
# ----------------------------------------------------------------------------
def init_koopman_params(key, encoder_layers, decoder_layers, steps, steps_back,
                        init_scale=1.0):
    def linear(k, fan_in, fan_out):
        kw, kb = jax.random.split(k)
        bound = 1.0 / np.sqrt(fan_in)
        w = jax.random.uniform(kw, (fan_in, fan_out), jnp.float32, -bound, bound)
        b = jax.random.uniform(kb, (1, fan_out), jnp.float32, -bound, bound)
        return w, b  # stored as [in, out] (PyTorch W^T)

    n_enc = len(encoder_layers) - 1
    n_dec = len(decoder_layers) - 1
    keys = jax.random.split(key, n_enc + n_dec + 1)

    enc_w, enc_b = [], []
    for k in range(n_enc):
        w, b = linear(keys[k], encoder_layers[k], encoder_layers[k + 1])
        enc_w.append(w); enc_b.append(b)

    dec_w, dec_b = [], []
    for k in range(n_dec):
        w, b = linear(keys[n_enc + k], decoder_layers[k], decoder_layers[k + 1])
        dec_w.append(w); dec_b.append(b)

    # dynamics: gaussian init with std 1/b, orthogonalize via SVD, * init_scale
    b_dim = decoder_layers[0]
    W = jax.random.normal(keys[-1], (b_dim, b_dim), jnp.float32) * (1.0 / b_dim)
    U, _, Vt = jnp.linalg.svd(W, full_matrices=False)
    W_dyn = (U @ Vt) * init_scale                     # PyTorch weight [out, in]
    dyn_fwd = W_dyn.T                                 # kernel form: q @ W_dyn^T
    dyn_back = jnp.linalg.pinv(W_dyn)                 # kernel form of backdynamics

    return dict(enc_w=enc_w, enc_b=enc_b, dec_w=dec_w, dec_b=dec_b,
                dyn_fwd=dyn_fwd, dyn_back=dyn_back,
                steps=steps, steps_back=steps_back)


# ----------------------------------------------------------------------------
# Pure-JAX reference (sequential rollout, default precision)
# ----------------------------------------------------------------------------
def reference_forward(x, params, mode="forward"):
    def mlp(h, ws, bs):
        for k in range(len(ws)):
            h = jnp.dot(h, ws[k]) + bs[k]
            if k < len(ws) - 1:
                h = jnp.tanh(h)
        return h

    dyn = params["dyn_fwd"] if mode == "forward" else params["dyn_back"]
    steps = params["steps"] if mode == "forward" else params["steps_back"]
    z = mlp(x, params["enc_w"], params["enc_b"])
    q, outs = z, []
    for _ in range(steps):
        q = jnp.dot(q, dyn)
        outs.append(mlp(q, params["dec_w"], params["dec_b"]))
    out_id = [mlp(z, params["dec_w"], params["dec_b"])]
    return outs, out_id


# ----------------------------------------------------------------------------
if __name__ == "__main__":
    encoder_layers = [64, 32, 16]
    decoder_layers = [16, 32, 64]
    steps, steps_back = 4, 4
    batch = 8

    key = jax.random.PRNGKey(0)
    pkey, xkey = jax.random.split(key)
    params = init_koopman_params(pkey, encoder_layers, decoder_layers,
                                 steps, steps_back, init_scale=1.0)
    x = jax.random.normal(xkey, (batch, encoder_layers[0]), jnp.float32)

    for mode in ("forward", "backward"):
        outs, out_id = koopman_forward(x, params, mode=mode)
        jax.block_until_ready(outs)
        jax.block_until_ready(out_id)

        ref_outs, ref_out_id = reference_forward(x, params, mode=mode)
        for a, b in zip(outs, ref_outs):
            np.testing.assert_allclose(np.asarray(a), np.asarray(b),
                                       rtol=2e-2, atol=2e-2)
        np.testing.assert_allclose(np.asarray(out_id[0]), np.asarray(ref_out_id[0]),
                                   rtol=2e-2, atol=2e-2)

    print("KERNEL_OK")
</pallas_src>

<mosaic_0001>
module attributes {stable_mosaic.version = 11 : i64} {
  func.func @kernel(%arg0: memref<8x64xf32, #tpu.memory_space<vmem>>, %arg1: memref<192x64xf32, #tpu.memory_space<vmem>>, %arg2: memref<40x64xf32, #tpu.memory_space<vmem>>) attributes {dimension_semantics = [], scalar_prefetch = 0 : i64, scratch_operands = 0 : i64, tpu.core_type = #tpu.core_type<tc>} {
    %c0 = arith.constant 0 : index
    %c0_0 = arith.constant 0 : index
    %0 = vector.load %arg0[%c0, %c0_0] : memref<8x64xf32, #tpu.memory_space<vmem>>, vector<8x64xf32>
    %c0_1 = arith.constant 0 : index
    %c0_2 = arith.constant 0 : index
    %1 = vector.load %arg1[%c0_1, %c0_2] : memref<192x64xf32, #tpu.memory_space<vmem>>, vector<64x32xf32>
    %c64 = arith.constant 64 : index
    %c0_3 = arith.constant 0 : index
    %2 = vector.load %arg1[%c64, %c0_3] : memref<192x64xf32, #tpu.memory_space<vmem>>, vector<1x32xf32>
    %cst = arith.constant dense<0.000000e+00> : vector<8x32xf32>
    %3 = tpu.matmul %0, %1, %cst {dimension_numbers = #tpu.dot_dimension_numbers<[1], [0], [0], [1], [0, 0, 1, 1], [], []>} : vector<8x64xf32>, vector<64x32xf32>, vector<8x32xf32> -> vector<8x32xf32>
    %4 = vector.broadcast %2 : vector<1x32xf32> to vector<8x32xf32>
    %5 = arith.addf %3, %4 : vector<8x32xf32>
    %6 = math.tanh %5 : vector<8x32xf32>
    %c72 = arith.constant 72 : index
    %c0_4 = arith.constant 0 : index
    %7 = vector.load %arg1[%c72, %c0_4] : memref<192x64xf32, #tpu.memory_space<vmem>>, vector<32x16xf32>
    %c104 = arith.constant 104 : index
    %c0_5 = arith.constant 0 : index
    %8 = vector.load %arg1[%c104, %c0_5] : memref<192x64xf32, #tpu.memory_space<vmem>>, vector<1x16xf32>
    %cst_6 = arith.constant dense<0.000000e+00> : vector<8x16xf32>
    %9 = tpu.matmul %6, %7, %cst_6 {dimension_numbers = #tpu.dot_dimension_numbers<[1], [0], [0], [1], [0, 0, 1, 1], [], []>} : vector<8x32xf32>, vector<32x16xf32>, vector<8x16xf32> -> vector<8x16xf32>
    %10 = vector.broadcast %8 : vector<1x16xf32> to vector<8x16xf32>
    %11 = arith.addf %9, %10 : vector<8x16xf32>
    %c112 = arith.constant 112 : index
    %c0_7 = arith.constant 0 : index
    %12 = vector.load %arg1[%c112, %c0_7] : memref<192x64xf32, #tpu.memory_space<vmem>>, vector<16x64xf32>
    %cst_8 = arith.constant dense<0.000000e+00> : vector<8x64xf32>
    %13 = tpu.matmul %11, %12, %cst_8 {dimension_numbers = #tpu.dot_dimension_numbers<[1], [0], [0], [1], [0, 0, 1, 1], [], []>} : vector<8x16xf32>, vector<16x64xf32>, vector<8x64xf32> -> vector<8x64xf32>
    %14 = vector.extract_strided_slice %13 {offsets = [0, 0], sizes = [8, 16], strides = [1, 1]} : vector<8x64xf32> to vector<8x16xf32>
    %15 = vector.extract_strided_slice %13 {offsets = [0, 16], sizes = [8, 16], strides = [1, 1]} : vector<8x64xf32> to vector<8x16xf32>
    %16 = vector.extract_strided_slice %13 {offsets = [0, 32], sizes = [8, 16], strides = [1, 1]} : vector<8x64xf32> to vector<8x16xf32>
    %17 = vector.extract_strided_slice %13 {offsets = [0, 48], sizes = [8, 16], strides = [1, 1]} : vector<8x64xf32> to vector<8x16xf32>
    %18 = tpu.concatenate %14, %15, %16, %17, %11 in 0 : vector<8x16xf32>, vector<8x16xf32>, vector<8x16xf32>, vector<8x16xf32>, vector<8x16xf32> -> vector<40x16xf32>
    %c128 = arith.constant 128 : index
    %c0_9 = arith.constant 0 : index
    %19 = vector.load %arg1[%c128, %c0_9] : memref<192x64xf32, #tpu.memory_space<vmem>>, vector<16x32xf32>
    %c144 = arith.constant 144 : index
    %c0_10 = arith.constant 0 : index
    %20 = vector.load %arg1[%c144, %c0_10] : memref<192x64xf32, #tpu.memory_space<vmem>>, vector<1x32xf32>
    %cst_11 = arith.constant dense<0.000000e+00> : vector<40x32xf32>
    %21 = tpu.matmul %18, %19, %cst_11 {dimension_numbers = #tpu.dot_dimension_numbers<[1], [0], [0], [1], [0, 0, 1, 1], [], []>} : vector<40x16xf32>, vector<16x32xf32>, vector<40x32xf32> -> vector<40x32xf32>
    %22 = vector.broadcast %20 : vector<1x32xf32> to vector<40x32xf32>
    %23 = arith.addf %21, %22 : vector<40x32xf32>
    %24 = math.tanh %23 : vector<40x32xf32>
    %c152 = arith.constant 152 : index
    %c0_12 = arith.constant 0 : index
    %25 = vector.load %arg1[%c152, %c0_12] : memref<192x64xf32, #tpu.memory_space<vmem>>, vector<32x64xf32>
    %c184 = arith.constant 184 : index
    %c0_13 = arith.constant 0 : index
    %26 = vector.load %arg1[%c184, %c0_13] : memref<192x64xf32, #tpu.memory_space<vmem>>, vector<1x64xf32>
    %cst_14 = arith.constant dense<0.000000e+00> : vector<40x64xf32>
    %27 = tpu.matmul %24, %25, %cst_14 {dimension_numbers = #tpu.dot_dimension_numbers<[1], [0], [0], [1], [0, 0, 1, 1], [], []>} : vector<40x32xf32>, vector<32x64xf32>, vector<40x64xf32> -> vector<40x64xf32>
    %28 = vector.broadcast %26 : vector<1x64xf32> to vector<40x64xf32>
    %29 = arith.addf %27, %28 : vector<40x64xf32>
    %c0_15 = arith.constant 0 : index
    %c0_16 = arith.constant 0 : index
    %30 = vector.load %arg2[%c0_15, %c0_16] : memref<40x64xf32, #tpu.memory_space<vmem>>, vector<40x64xf32>
    tpu.vector_store %arg2[%c0_15, %c0_16], %29 {strides = array<i32>} : memref<40x64xf32, #tpu.memory_space<vmem>>, vector<40x64xf32>,
    return
  }
}

</mosaic_0001>

<bundles_post_ra>
// kernel: tpu_custom_call.1
= control target key start
LH: loop header
LB: loop body
LE: loop exit
PB: predicated region body
PF: predicated region fallthrough
CT: control target
= control target key end

     0   :  { %v720_v3 = vmov 0.0|0.0   ;;  %vm721_vm0 = vmmov 0   ;;  %v722_v6 = vmov 0.0   ;;  %s887_s0 = inlined_call_operand.vmem [shape: f32[8,64], index: 0, kind: input, shape index: {}]   ;;  %s888_s1 = inlined_call_operand.vmem [shape: f32[192,64], index: 1, kind: input, shape index: {}]   ;;  %s889_s2 = inlined_call_operand.hbm [shape: f32[40,64], index: 2, kind: output, shape index: {}]  }
   0x1   :  { %v13_v0 = vld [vmem:[%s888_s1] sm:$0xff]  ;;  %v14_v1 = vld [vmem:[%s888_s1 + $0x8] sm:$0xff]  ;;  %v15_v2 = vld [vmem:[%s888_s1 + $0x10] sm:$0xff]  ;;  %641 = vmatprep.subr.bf16.mxu0 %v720_v3  ;;  %578 = vmatprep.mubr.msk.f32.mxu0 %vm721_vm0, %v722_v6 }
   0x2   :  { %v642_v4 = vpack.c.bf16 %v14_v1, %v13_v0  ;;  %v16_v5 = vld [vmem:[%s888_s1 + $0x18] sm:$0xff]  ;;  %653 = vmatprep.subr.bf16.mxu1 %v720_v3  ;;  %589 = vmatprep.mubr.msk.f32.mxu1 %vm721_vm0, %v722_v6 }
   0x3   :  { %v645_v7 = vpack.c.bf16 %v16_v5, %v15_v2 }
   0x4   :  { %643 = vmatpush3.bf16.msra.mxu0 %v642_v4 }
   0x5   :  { %7 = vsyncpa [#allocation3], 0  ;;  %644 = vmatprep.subr.bf16.mxu0 %v720_v3  ;;  %v17_v8 = vld [vmem:[%s888_s1 + $0x20] sm:$0xff]  ;;  %v18_v9 = vld [vmem:[%s888_s1 + $0x28] sm:$0xff]  ;;  %vm26_vm1 = vcmask 523264   ;;  %vm110_vm2 = vcmask 261120  }
   0x6   :  { %v648_v10 = vpack.c.bf16 %v18_v9, %v17_v8  ;;  %v19_v11 = vld [vmem:[%s888_s1 + $0x30] sm:$0xff]  ;;  %v20_v12 = vld [vmem:[%s888_s1 + $0x38] sm:$0xff]  ;;  %v12_v14 = vld [vmem:[%s887_s0] sm:$0xff]  ;;  %vm186_vm3 = vcmask 130048   ;;  %s723_s18 = smov 80   ;;  %s724_s19 = smov 112  }
   0x7   :  { %v651_v13 = vpack.c.bf16 %v20_v12, %v19_v11  ;;  %v101_v15 = vld [vmem:[%s888_s1 + $0x48] sm:$0xff]  ;;  %v102_v16 = vld [vmem:[%s888_s1 + $0x50] sm:$0xff]  ;;  %v103_v17 = vld [vmem:[%s888_s1 + $0x58] sm:$0xff]  ;;  %s725_s20 = smov 96   ;;  %s726_s0 = smov [#allocation2]  }
   0x8   :  { %646 = vmatpush3.bf16.msra.mxu0 %v645_v7  ;;  %v654_v18 = vpack.c.bf16 %v102_v16, %v101_v15  ;;  %v104_v19 = vld [vmem:[%s888_s1 + $0x60] sm:$0xff]  ;;  %v184_v25 = vld [vmem:[%s888_s1 + $0x70] sm:$0xff]  ;;  %v185_v26 = vld [vmem:[%s888_s1 + $0x78] sm:$0xff] }
   0x9   :  { %647 = vmatprep.subr.bf16.mxu0 %v720_v3  ;;  %v657_v20 = vpack.c.bf16 %v104_v19, %v103_v17  ;;  %v512_v21 = vld [vmem:[%s888_s1 + $0x40] ss:$0 sm:$0xff]  ;;  %v660_v27 = vpack.c.bf16 %v185_v26, %v184_v25  ;;  %v268_v30 = vld [vmem:[%s888_s1 + $0x88] sm:$0xff]  ;;  %v377_v38 = vld [vmem:[%s888_s1 + $0x98] sm:$0xff] }
   0xa   :  { %655 = vmatpush3.bf16.msra.mxu1 %v654_v18  ;;  %v267_v29 = vld [vmem:[%s888_s1 + $0x80] sm:$0xff]  ;;  %v514_v31 = vld [vmem:[%s888_s1 + $0x68] ss:$0 sm:$0xff]  ;;  %v380_v42 = vld [vmem:[%s888_s1 + $0xb0] sm:$0xff] }
   0xb   :  { %656 = vmatprep.subr.bf16.mxu1 %v720_v3  ;;  %v663_v33 = vpack.c.bf16 %v268_v30, %v267_v29  ;;  %v378_v39 = vld [vmem:[%s888_s1 + $0xa0] sm:$0xff]  ;;  %v379_v40 = vld [vmem:[%s888_s1 + $0xa8] sm:$0xff]  ;;  %v517_v47 = vld [vmem:[%s888_s1 + $0x90] ss:$0 sm:$0xff] }
   0xc   :  { %649 = vmatpush3.bf16.msra.mxu0 %v648_v10  ;;  %v666_v41 = vpack.c.bf16 %v378_v39, %v377_v38  ;;  %v669_v43 = vpack.c.bf16 %v380_v42, %v379_v40  ;;  %v523_v4 = vld [vmem:[%s888_s1 + $0xb8] ss:$0 sm:$0xff]  ;;  %s501_s1 = sshll.u32 %s726_s0, 4  ;;  %s502_s1 = int_to_ptr.vmem [resolvable:$true] %s501_s1 }
   0xd   :  { %650 = vmatprep.subr.bf16.mxu0 %v720_v3  ;;  %s696_s5 = scalar_lea.vmem %s502_s1, 640  ;;  %p701_p1 = scmp.lt.s32.totalorder %s502_s1, %s502_s1 }
   0xe   :  { %658 = vmatpush3.bf16.msra.mxu1 %v657_v20  ;;  %p697_p0 = scmp.ne.s32.totalorder %s502_s1, %s696_s5  ;;  %p702_p2 = scmp.lt.s32.totalorder %s696_s5, %s696_s5 }
   0xf   :  { %659 = vmatprep.subr.bf16.mxu1 %v720_v3 }
  0x10   :  { %652 = vmatpush3.bf16.msra.mxu0 %v651_v13  ;;  %p703_p3 = por %p702_p2, %p701_p1 }
  0x11   :  { %665 = vmatprep.subr.bf16.mxu0 %v720_v3 }
  0x12   :  { %p704_p4 = pnand %p703_p3, %p697_p0 }
  0x13   :  { %579 = vmatmul.mubr.msk.f32.vlgmr.msra.gmra.mrb[0].mxu0 %vm26_vm1, %v12_v14 }
  0x14   :  { %626 = vmatprep.mubr.msk.f32.mxu0 %vm721_vm0, %v722_v6  ;;  %667 = vmatpush3.bf16.msra.mxu0 %v666_v41 }
  0x15   :  { %668 = vmatprep.subr.bf16.mxu0 %v720_v3 }
  0x18   :  { %670 = vmatpush3.bf16.msra.mxu0 %v669_v43 }
  0xe6   :  { %v96_v22 = vpop.f32.mrb[0].mxu0 }
  0xe7   :  { %v97_v23 = vadd.f32 %v512_v21, %v96_v22  ;;  %v580_v24 = vpop.f32.mrb[1].mxu0 }
  0xe9   :  { %684 = vtanh.f32 %v97_v23 }
  0xf3   :  { %v685_v28 = vpop.eup %684 }
  0xf4   :  { %590 = vmatmul.mubr.msk.f32.vlgmr.msra.gmra.mrb[0].mxu1 %vm110_vm2, %v685_v28 }
  0xf5   :  { %661 = vmatpush3.bf16.msra.mxu1 %v660_v27  ;;  %596 = vmatprep.mubr.msk.f32.mxu1 %vm721_vm0, %v722_v6 }
  0xf6   :  { %662 = vmatprep.subr.bf16.mxu1 %v720_v3 }
 0x1c7   :  { %v180_v32 = vpop.f32.mrb[0].mxu1 }
 0x1c8   :  { %v181_v34 = vadd.f32 %v514_v31, %v180_v32  ;;  %v591_v35 = vpop.f32.mrb[1].mxu1 }
 0x1ca   :  { %597 = vmatmul.mubr.msk.f32.vlgmr.msra.gmra.mrb[2].mxu1 %vm186_vm3, %v181_v34 }
 0x1cb   :  { %664 = vmatpush3.bf16.msra.mxu1 %v663_v33  ;;  %603 = vmatprep.mubr.msk.f32.mxu1 %vm721_vm0, %v722_v6 }
 0x1cc   :  { %671 = vmatprep.subr.bf16.mxu1 %v720_v3 }
 0x29d   :  { %v256_v36 = vpop.f32.mrb[2].mxu1 }
 0x29e   :  { %265 = vrot.lane.b32.xlu1 %v256_v36, %s723_s18  ;;  %261 = vrot.lane.b32.xlu0 %v256_v36, %s724_s19  ;;  %v598_v37 = vpop.f32.mrb[3].mxu1 }
 0x29f   :  { %604 = vmatmul.mubr.msk.f32.vlgmr.msra.gmra.mrb[4].mxu1 %vm186_vm3, %v256_v36 }
 0x2a0   :  { %606 = vmatprep.mubr.msk.f32.mxu1 %vm721_vm0, %v722_v6  ;;  %673 = vmatpush3.bf16.msra.mxu1 %v666_v41 }
 0x2a1   :  { %672 = vmatprep.subr.bf16.mxu1 %v720_v3 }
 0x2a2   :  { %263 = vrot.lane.b32.xlu0 %v256_v36, %s725_s20 }
 0x2a4   :  { %674 = vmatpush3.bf16.msra.mxu1 %v669_v43 }
 0x310   :  { %v262_v44 = vpop.permute.xlu0 %261  ;;  %v266_v46 = vpop.permute.xlu1 %265 }
 0x311   :  { %607 = vmatmul.mubr.msk.f32.gmra.mrb[6].mxu1 %vm186_vm3, %v262_v44 }
 0x312   :  { %609 = vmatprep.mubr.msk.f32.mxu1 %vm721_vm0, %v722_v6 }
 0x314   :  { %v264_v45 = vpop.permute.xlu0 %263 }
 0x315   :  { %610 = vmatmul.mubr.msk.f32.gmra.mrb[8].mxu1 %vm186_vm3, %v264_v45 }
 0x316   :  { %612 = vmatprep.mubr.msk.f32.mxu1 %vm721_vm0, %v722_v6 }
 0x319   :  { %613 = vmatmul.mubr.msk.f32.gmra.mrb[10].mxu1 %vm186_vm3, %v266_v46 }
 0x31a   :  { %615 = vmatprep.mubr.msk.f32.mxu1 %vm721_vm0, %v722_v6 }
 0x31d   :  { %616 = vmatmul.mubr.msk.f32.gmra.mrb[12].mxu1 %vm186_vm3, %v181_v34 }
 0x31e   :  { %638 = vmatprep.mubr.msk.f32.mxu1 %vm721_vm0, %v722_v6 }
 0x372   :  { %v348_v48 = vpop.f32.mrb[4].mxu1 }
 0x373   :  { %v349_v49 = vadd.f32 %v517_v47, %v348_v48  ;;  %v605_v50 = vpop.f32.mrb[5].mxu1 }
 0x375   :  { %686 = vtanh.f32 %v349_v49 }
 0x37f   :  { %v687_v51 = vpop.eup %686 }
 0x380   :  { %627 = vmatmul.mubr.msk.f32.vlgmr.msra.gmra.mrb[2].mxu0 %vm110_vm2, %v687_v51 }
 0x381   :  { %629 = vmatprep.mubr.msk.f32.mxu0 %vm721_vm0, %v722_v6 }
 0x3e4   :  { %v353_v52 = vpop.f32.mrb[6].mxu1 }
 0x3e5   :  { %v354_v53 = vadd.f32 %v517_v47, %v353_v52  ;;  %v608_v54 = vpop.f32.mrb[7].mxu1 }
 0x3e7   :  { %688 = vtanh.f32 %v354_v53 }
 0x3e8   :  { %v358_v55 = vpop.f32.mrb[8].mxu1 }
 0x3e9   :  { %v359_v56 = vadd.f32 %v517_v47, %v358_v55  ;;  %v611_v57 = vpop.f32.mrb[9].mxu1 }
 0x3eb   :  { %690 = vtanh.f32 %v359_v56 }
 0x3ec   :  { %v363_v58 = vpop.f32.mrb[10].mxu1 }
 0x3ed   :  { %v364_v59 = vadd.f32 %v517_v47, %v363_v58  ;;  %v614_v60 = vpop.f32.mrb[11].mxu1 }
 0x3ef   :  { %692 = vtanh.f32 %v364_v59 }
 0x3f0   :  { %v368_v61 = vpop.f32.mrb[12].mxu1 }
 0x3f1   :  { %v689_v62 = vpop.eup %688  ;;  %v369_v63 = vadd.f32 %v517_v47, %v368_v61  ;;  %v617_v0 = vpop.f32.mrb[13].mxu1 }
 0x3f2   :  { %630 = vmatmul.mubr.msk.f32.gmra.mrb[4].mxu0 %vm110_vm2, %v689_v62 }
 0x3f3   :  { %694 = vtanh.f32 %v369_v63  ;;  %632 = vmatprep.mubr.msk.f32.mxu0 %vm721_vm0, %v722_v6 }
 0x3f5   :  { %v691_v1 = vpop.eup %690 }
 0x3f6   :  { %633 = vmatmul.mubr.msk.f32.gmra.mrb[6].mxu0 %vm110_vm2, %v691_v1 }
 0x3f7   :  { %635 = vmatprep.mubr.msk.f32.mxu0 %vm721_vm0, %v722_v6 }
 0x3f9   :  { %v693_v2 = vpop.eup %692 }
 0x3fa   :  { %636 = vmatmul.mubr.msk.f32.gmra.mrb[8].mxu0 %vm110_vm2, %v693_v2 }
 0x3fd   :  { %v695_v3 = vpop.eup %694 }
 0x3fe   :  { %639 = vmatmul.mubr.msk.f32.vlgmr.msra.gmra.mrb[14].mxu1 %vm110_vm2, %v695_v3 }
 0x453   :  { %v467_v5 = vpop.f32.mrb[2].mxu0 }
 0x454   :  { %v468_v7 = vadd.f32 %v523_v4, %v467_v5  ;;  %v628_v8 = vpop.f32.mrb[3].mxu0 }
 0x456   :  { %491 = vst.msk [vmem:[#allocation2] sm:$0xff] %vm26_vm1, %v468_v7 }
 0x4c5   :  { %v472_v9 = vpop.f32.mrb[4].mxu0 }
 0x4c6   :  { %v473_v10 = vadd.f32 %v523_v4, %v472_v9  ;;  %v631_v11 = vpop.f32.mrb[5].mxu0 }
 0x4c8   :  { %492 = vst.msk [vmem:[#allocation2 + $0x8] sm:$0xff] %vm26_vm1, %v473_v10 }
 0x4c9   :  { %v477_v6 = vpop.f32.mrb[6].mxu0 }
 0x4ca   :  { %v478_v12 = vadd.f32 %v523_v4, %v477_v6  ;;  %v634_v13 = vpop.f32.mrb[7].mxu0 }
 0x4cc   :  { %493 = vst.msk [vmem:[#allocation2 + $0x10] sm:$0xff] %vm26_vm1, %v478_v12 }
 0x4cd   :  { %v482_v14 = vpop.f32.mrb[8].mxu0 }
 0x4ce   :  { %v483_v15 = vadd.f32 %v523_v4, %v482_v14  ;;  %v637_v16 = vpop.f32.mrb[9].mxu0 }
 0x4d0   :  { %494 = vst.msk [vmem:[#allocation2 + $0x18] sm:$0xff] %vm26_vm1, %v483_v15 }
 0x4d1   :  { %v487_v17 = vpop.f32.mrb[14].mxu1 }
 0x4d2   :  { %v488_v18 = vadd.f32 %v523_v4, %v487_v17  ;;  %v640_v19 = vpop.f32.mrb[15].mxu1 }
 0x4d4   :  { %495 = vst.msk [vmem:[#allocation2 + $0x20] sm:$0xff] %vm26_vm1, %v488_v18 }
 0x4d5   :  { %707 = shalt.err (!%p704_p4)
}
 0x4d6   :  { %s708_s8 = scalar_lea.hbm %s889_s2, 640 }
 0x4d7   :  { %p709_p5 = scmp.ne.s32.totalorder %s889_s2, %s708_s8  ;;  %p712_p6 = scmp.lt.u32.totalorder %s708_s8, %s889_s2 }
 0x4d9   :  { %p714_p7 = pnand %p712_p6, %p709_p5 }
 0x4db   :  { %717 = shalt.err (!%p714_p7)
}
 0x4dc   :  { %s727_s13 = smov 128   ;;  %s728_s14 = smov 8  }
 0x4dd   :  { %507 = dma.vmem_to_hbm [thread:$0]  %s502_s1, 640, %s889_s2, [#allocation3], %s727_s13, %s727_s13, %s728_s14  }
 0x4de   :  { %718 = dma.done.wait [#allocation3], 640  }
 0x4df   :  { %719 = vsyncadd [#allocation3], 4294966656 }
 0x4e0   :  { %511 = vsyncpa [#allocation3], 1 }

</bundles_post_ra>
